<compile_context>
chip_gen: v7x
topology: tpu7x:2x2x1
jax: 0.10.0
libtpu: 0.0.40
codegen_flags: <defaults>
</compile_context>

<pallas_src>
import math

import jax
import jax.numpy as jnp
from jax.experimental import pallas as pl
from jax.experimental.pallas import tpu as pltpu

_SQRT_2_OVER_PI = math.sqrt(2.0 / math.pi)
_GELU_C = 0.044715

_LANE = 128      # lane width
_SUBLANE = 16    # bf16 sublane packing for the token dim
_FALLBACK_VMEM = 64 * 1024 * 1024   # assume v7x (smallest VMEM) if query fails


def _gelu_tanh(x):
    # TODO(synk): nn.GELU() defaults to the exact erf GELU; the tanh
    # approximation (== nn.GELU(approximate='tanh'), max |delta| ~1e-3) is used
    # because erf lowering is not guaranteed on the Mosaic backend and tanh
    # runs on the EUP slot essentially for free.
    return 0.5 * x * (1.0 + jnp.tanh(_SQRT_2_OVER_PI * (x + _GELU_C * x * x * x)))


def _ffn_kernel(x_ref, w1_ref, b1_ref, w2_ref, b2_ref, o_ref, acc_ref, xb_ref):
    # x_ref : (TM, D)  native dtype   | w1_ref: (D, TH) bf16 | b1_ref: (1, TH) f32
    # w2_ref: (TH, D) bf16            | b2_ref: (1, D)  f32  | o_ref : (TM, D)
    # acc_ref: (TM, D) f32 scratch    | xb_ref: (TM, D) bf16 scratch
    k = pl.program_id(1)

    @pl.when(k == 0)
    def _init():
        acc_ref[...] = jnp.zeros_like(acc_ref)
        # Cast the activation tile to bf16 once per M tile (inside the kernel,
        # after the DMA, so the wrapper never materializes a bf16 copy in HBM).
        xb_ref[...] = x_ref[...].astype(jnp.bfloat16)

    h = jnp.dot(xb_ref[...], w1_ref[...], preferred_element_type=jnp.float32)
    h = _gelu_tanh(h + b1_ref[...])
    acc_ref[...] += jnp.dot(h.astype(jnp.bfloat16), w2_ref[...],
                            preferred_element_type=jnp.float32)

    @pl.when(k == pl.num_programs(1) - 1)
    def _finalize():
        o_ref[...] = (acc_ref[...] + b2_ref[...]).astype(o_ref.dtype)


# ----------------------------------------------------------------------------
# Tiling / VMEM heuristics
# ----------------------------------------------------------------------------

def _round_up(x, m):
    return ((x + m - 1) // m) * m


def _probe_buffered():
    try:
        pl.BlockSpec((_SUBLANE, _LANE), lambda i: (0, 0),
                     pipeline_mode=pl.Buffered(1))
        return True
    except Exception:
        return False


_HAS_BUFFERED = _probe_buffered()


def _resident_spec(block_shape, index_map):
    """Grid-invariant operand: single-buffer it if this JAX supports Buffered."""
    if _HAS_BUFFERED:
        return pl.BlockSpec(block_shape, index_map, pipeline_mode=pl.Buffered(1))
    return pl.BlockSpec(block_shape, index_map)


def _vmem_caps():
    """Generation-aware (select_budget, vmem_limit) in bytes."""
    try:
        cap = int(pltpu.get_tpu_info().vmem_capacity_bytes)
        if cap <= 0:
            cap = _FALLBACK_VMEM
    except Exception:
        cap = _FALLBACK_VMEM
    return int(cap * 0.65), int(cap * 0.80)


def _vmem_bytes(tile_m, tile_h, d_model, d_hidden, x_bytes, out_bytes, wbuf):
    bf16, f32 = 2, 4
    x_io = 2 * tile_m * d_model * x_bytes        # double-buffered input tile
    x_cast = tile_m * d_model * bf16             # in-kernel bf16 copy of x
    o_io = 2 * tile_m * d_model * out_bytes      # double-buffered output tile
    acc = tile_m * d_model * f32                 # f32 accumulator scratch
    wts = wbuf * 2 * d_model * tile_h * bf16     # w1 + w2 tiles
    bias = wbuf * tile_h * f32 + d_model * f32
    act = tile_m * tile_h * (f32 + bf16)         # f32 h + its bf16 copy for fc2
    slack = 2 * 1024 * 1024                      # Mosaic internal scratch
    return x_io + x_cast + o_io + acc + wts + bias + act + slack


def _pick_tiles(d_model, d_hidden, x_bytes, out_bytes, budget):
    """Largest tile_m first; within it the largest tile_h (full H preferred)."""
    th_cands = [d_hidden] + [t for t in (2048, 1024, 512, 256, 128)
                             if t < d_hidden and d_hidden % t == 0]
    tm_cands = (2048, 1024, 512, 256, 128, 64, 32, 16)
    for tm in tm_cands:
        for th in th_cands:
            wbuf = 1 if (th == d_hidden and _HAS_BUFFERED) else 2
            if _vmem_bytes(tm, th, d_model, d_hidden,
                           x_bytes, out_bytes, wbuf) <= budget:
                return tm, th
    return 16, th_cands[-1]


# ----------------------------------------------------------------------------
# Public wrapper
# ----------------------------------------------------------------------------

def feed_forward_net(x, w1, b1, w2, b2, *, tile_m=None, tile_h=None,
                     out_dtype=None):
    """x: (..., D); w1: (D, 4D); b1: (4D,); w2: (4D, D); b2: (D,).

    Weights are (in_features, out_features), i.e. the transpose of the PyTorch
    nn.Linear storage, so the hot path is two plain MXU matmuls.  Weights are
    cast to bf16 here once per call; production callers should cache the bf16
    copies and pass them in directly.
    """
    *lead, d_model = x.shape
    d_hidden = w1.shape[1]
    assert w1.shape == (d_model, d_hidden)
    assert b1.shape == (d_hidden,)
    assert w2.shape == (d_hidden, d_model)
    assert b2.shape == (d_model,)

    out_dtype = x.dtype if out_dtype is None else jnp.dtype(out_dtype)
    x_bytes = jnp.dtype(x.dtype).itemsize
    out_bytes = jnp.dtype(out_dtype).itemsize
    m = math.prod(lead) if lead else 1

    if d_model % _LANE or d_hidden % _LANE:
        # TODO(synk): feature dims not multiples of 128 give masked (lane-sparse)
        # stores and partially filled MXU passes; pad D/H to 128 (256 on
        # v6e/v7x) upstream for best throughput.  Correctness is unaffected.
        pass

    select_budget, vmem_limit = _vmem_caps()
    auto_tm, auto_th = _pick_tiles(d_model, d_hidden, x_bytes, out_bytes,
                                   select_budget)
    if tile_m is None:
        tile_m = auto_tm
    if tile_h is None:
        tile_h = auto_th
    if d_hidden % tile_h:
        tile_h = d_hidden  # reduction tiles must divide H exactly

    # v7x has 2 TensorCores: give the "parallel" M axis >= 2 steps when possible.
    if m >= 2 * _SUBLANE:
        tile_m = min(tile_m, _round_up(-(-m // 2), _SUBLANE))
    if tile_m >= m:
        tile_m = m                                    # single full block
    else:
        tile_m = max(_SUBLANE, (tile_m // _SUBLANE) * _SUBLANE)

    m_tiles = -(-m // tile_m)          # ragged tail handled by masked stores
    h_tiles = d_hidden // tile_h
    resident = h_tiles == 1

    # No activation cast / pad here (done in-kernel); weights cast once.
    x2d = x.reshape(m, d_model)
    w1_bf = w1 if w1.dtype == jnp.bfloat16 else w1.astype(jnp.bfloat16)
    w2_bf = w2 if w2.dtype == jnp.bfloat16 else w2.astype(jnp.bfloat16)
    b1_2d = b1.reshape(1, d_hidden).astype(jnp.float32)
    b2_2d = b2.reshape(1, d_model).astype(jnp.float32)

    if resident:
        w1_spec = _resident_spec((d_model, d_hidden), lambda i, k: (0, 0))
        b1_spec = _resident_spec((1, d_hidden), lambda i, k: (0, 0))
        w2_spec = _resident_spec((d_hidden, d_model), lambda i, k: (0, 0))
    else:
        w1_spec = pl.BlockSpec((d_model, tile_h), lambda i, k: (0, k))
        b1_spec = pl.BlockSpec((1, tile_h), lambda i, k: (0, k))
        w2_spec = pl.BlockSpec((tile_h, d_model), lambda i, k: (k, 0))
    b2_spec = _resident_spec((1, d_model), lambda i, k: (0, 0))

    out2d = pl.pallas_call(
        _ffn_kernel,
        out_shape=jax.ShapeDtypeStruct((m, d_model), out_dtype),
        grid_spec=pltpu.PrefetchScalarGridSpec(
            num_scalar_prefetch=0,
            grid=(m_tiles, h_tiles),
            in_specs=[
                pl.BlockSpec((tile_m, d_model), lambda i, k: (i, 0)),
                w1_spec,
                b1_spec,
                w2_spec,
                b2_spec,
            ],
            out_specs=pl.BlockSpec((tile_m, d_model), lambda i, k: (i, 0)),
            scratch_shapes=[
                pltpu.VMEM((tile_m, d_model), jnp.float32),   # f32 accumulator
                pltpu.VMEM((tile_m, d_model), jnp.bfloat16),  # cached bf16 x
            ],
        ),
        compiler_params=pltpu.CompilerParams(
            dimension_semantics=("parallel", "arbitrary"),
            vmem_limit_bytes=vmem_limit,
        ),
    )(x2d, w1_bf, b1_2d, w2_bf, b2_2d)

    return out2d.reshape(*lead, d_model)


# ----------------------------------------------------------------------------
# Self-test
# ----------------------------------------------------------------------------

def _reference(x, w1, b1, w2, b2):
    # Pure-JAX reference mirroring the kernel numerics (bf16 operands, f32 acc,
    # tanh-GELU).  Divergence from the exact-erf PyTorch module is <~1e-3/elem.
    h = jnp.dot(x.astype(jnp.bfloat16), w1.astype(jnp.bfloat16),
                preferred_element_type=jnp.float32) + b1
    h = _gelu_tanh(h)
    o = jnp.dot(h.astype(jnp.bfloat16), w2.astype(jnp.bfloat16),
                preferred_element_type=jnp.float32) + b2
    return o.astype(x.dtype)


if __name__ == "__main__":
    # Module config: model_dim=128 -> hidden = 4*128 = 512 (lane-dense, MXU
    # friendly); tokens = batch * seq = 16.
    model_dim = 128
    hidden_dim = 4 * model_dim
    batch, seq = 2, 8

    key = jax.random.PRNGKey(0)
    kx, kw1, kb1, kw2, kb2 = jax.random.split(key, 5)

    # Mimic nn.Linear init: U(-1/sqrt(fan_in), 1/sqrt(fan_in))
    bound1 = 1.0 / math.sqrt(model_dim)
    bound2 = 1.0 / math.sqrt(hidden_dim)
    w1 = jax.random.uniform(kw1, (model_dim, hidden_dim), jnp.float32, -bound1, bound1)
    b1 = jax.random.uniform(kb1, (hidden_dim,), jnp.float32, -bound1, bound1)
    w2 = jax.random.uniform(kw2, (hidden_dim, model_dim), jnp.float32, -bound2, bound2)
    b2 = jax.random.uniform(kb2, (model_dim,), jnp.float32, -bound2, bound2)

    x = jax.random.normal(kx, (batch, seq, model_dim), jnp.float32)

    out = feed_forward_net(x, w1, b1, w2, b2)
    out = jax.block_until_ready(out)

    ref = _reference(x, w1, b1, w2, b2)
    assert out.shape == (batch, seq, model_dim)
    err = float(jnp.max(jnp.abs(out - ref)))
    assert jnp.allclose(out, ref, atol=1e-2, rtol=1e-2), f"max abs err {err}"

    print("KERNEL_OK")
</pallas_src>

<mosaic_0001>
module attributes {stable_mosaic.version = 11 : i64} {
  func.func @_ffn_kernel(%arg0: i32, %arg1: i32, %arg2: memref<16x128xf32, #tpu.memory_space<vmem>>, %arg3: memref<128x512xbf16, #tpu.memory_space<vmem>>, %arg4: memref<1x512xf32, #tpu.memory_space<vmem>>, %arg5: memref<512x128xbf16, #tpu.memory_space<vmem>>, %arg6: memref<1x128xf32, #tpu.memory_space<vmem>>, %arg7: memref<16x128xf32, #tpu.memory_space<vmem>>, %arg8: memref<16x128xf32, #tpu.memory_space<vmem>>, %arg9: memref<16x128xbf16, #tpu.memory_space<vmem>>) attributes {dimension_semantics = [#tpu.dimension_semantics<parallel>, #tpu.dimension_semantics<arbitrary>], iteration_bounds = array<i64: 1, 1>, scalar_prefetch = 0 : i64, scratch_operands = 2 : i64, tpu.core_type = #tpu.core_type<tc>, window_params = [{transform_indices = @transform_0, window_bounds = array<i64: 16, 128>}, {pipeline_mode = #tpu.pipeline_mode<synchronous>, transform_indices = @transform_1, window_bounds = array<i64: 128, 512>}, {pipeline_mode = #tpu.pipeline_mode<synchronous>, transform_indices = @transform_2, window_bounds = array<i64: 1, 512>}, {pipeline_mode = #tpu.pipeline_mode<synchronous>, transform_indices = @transform_3, window_bounds = array<i64: 512, 128>}, {pipeline_mode = #tpu.pipeline_mode<synchronous>, transform_indices = @transform_4, window_bounds = array<i64: 1, 128>}, {transform_indices = @transform_5, window_bounds = array<i64: 16, 128>}]} {
    %c0_i32 = arith.constant 0 : i32
    %0 = arith.cmpi eq, %arg1, %c0_i32 : i32
    %1 = arith.extui %0 : i1 to i32
    %c0_i32_0 = arith.constant 0 : i32
    %2 = arith.cmpi ne, %1, %c0_i32_0 : i32
    scf.if %2 {
      %cst_19 = arith.constant 0.000000e+00 : f32
      %31 = vector.broadcast %cst_19 : f32 to vector<16x128xf32>
      %c0_20 = arith.constant 0 : index
      %c0_21 = arith.constant 0 : index
      %32 = vector.load %arg8[%c0_20, %c0_21] : memref<16x128xf32, #tpu.memory_space<vmem>>, vector<16x128xf32>
      tpu.vector_store %arg8[%c0_20, %c0_21], %31 {strides = array<i32>} : memref<16x128xf32, #tpu.memory_space<vmem>>, vector<16x128xf32>,
      %c0_22 = arith.constant 0 : index
      %c0_23 = arith.constant 0 : index
      %33 = vector.load %arg2[%c0_22, %c0_23] : memref<16x128xf32, #tpu.memory_space<vmem>>, vector<16x128xf32>
      %34 = arith.truncf %33 : vector<16x128xf32> to vector<16x128xbf16>
      %c0_24 = arith.constant 0 : index
      %c0_25 = arith.constant 0 : index
      %35 = vector.load %arg9[%c0_24, %c0_25] : memref<16x128xbf16, #tpu.memory_space<vmem>>, vector<16x128xbf16>
      tpu.vector_store %arg9[%c0_24, %c0_25], %34 {strides = array<i32>} : memref<16x128xbf16, #tpu.memory_space<vmem>>, vector<16x128xbf16>,
    } else {
    }
    %c0 = arith.constant 0 : index
    %c0_1 = arith.constant 0 : index
    %3 = vector.load %arg9[%c0, %c0_1] : memref<16x128xbf16, #tpu.memory_space<vmem>>, vector<16x128xbf16>
    %c0_2 = arith.constant 0 : index
    %c0_3 = arith.constant 0 : index
    %4 = vector.load %arg3[%c0_2, %c0_3] : memref<128x512xbf16, #tpu.memory_space<vmem>>, vector<128x512xbf16>
    %cst = arith.constant dense<0.000000e+00> : vector<16x512xf32>
    %5 = tpu.matmul %3, %4, %cst {dimension_numbers = #tpu.dot_dimension_numbers<[1], [0], [0], [1], [0, 0, 1, 1], [], []>} : vector<16x128xbf16>, vector<128x512xbf16>, vector<16x512xf32> -> vector<16x512xf32>
    %c0_4 = arith.constant 0 : index
    %c0_5 = arith.constant 0 : index
    %6 = vector.load %arg4[%c0_4, %c0_5] : memref<1x512xf32, #tpu.memory_space<vmem>>, vector<1x512xf32>
    %7 = vector.broadcast %6 : vector<1x512xf32> to vector<16x512xf32>
    %8 = arith.addf %5, %7 : vector<16x512xf32>
    %cst_6 = arith.constant 5.000000e-01 : f32
    %9 = vector.broadcast %cst_6 : f32 to vector<16x512xf32>
    %10 = arith.mulf %9, %8 : vector<16x512xf32>
    %cst_7 = arith.constant 4.471500e-02 : f32
    %11 = vector.broadcast %cst_7 : f32 to vector<16x512xf32>
    %12 = arith.mulf %11, %8 : vector<16x512xf32>
    %13 = arith.mulf %12, %8 : vector<16x512xf32>
    %14 = arith.mulf %13, %8 : vector<16x512xf32>
    %15 = arith.addf %8, %14 : vector<16x512xf32>
    %cst_8 = arith.constant 0.797884583 : f32
    %16 = vector.broadcast %cst_8 : f32 to vector<16x512xf32>
    %17 = arith.mulf %16, %15 : vector<16x512xf32>
    %18 = math.tanh %17 : vector<16x512xf32>
    %cst_9 = arith.constant 1.000000e+00 : f32
    %19 = vector.broadcast %cst_9 : f32 to vector<16x512xf32>
    %20 = arith.addf %19, %18 : vector<16x512xf32>
    %21 = arith.mulf %10, %20 : vector<16x512xf32>
    %c0_10 = arith.constant 0 : index
    %c0_11 = arith.constant 0 : index
    %22 = vector.load %arg8[%c0_10, %c0_11] : memref<16x128xf32, #tpu.memory_space<vmem>>, vector<16x128xf32>
    %23 = arith.truncf %21 : vector<16x512xf32> to vector<16x512xbf16>
    %c0_12 = arith.constant 0 : index
    %c0_13 = arith.constant 0 : index
    %24 = vector.load %arg5[%c0_12, %c0_13] : memref<512x128xbf16, #tpu.memory_space<vmem>>, vector<512x128xbf16>
    %cst_14 = arith.constant dense<0.000000e+00> : vector<16x128xf32>
    %25 = tpu.matmul %23, %24, %cst_14 {dimension_numbers = #tpu.dot_dimension_numbers<[1], [0], [0], [1], [0, 0, 1, 1], [], []>} : vector<16x512xbf16>, vector<512x128xbf16>, vector<16x128xf32> -> vector<16x128xf32>
    %26 = arith.addf %22, %25 : vector<16x128xf32>
    %c0_15 = arith.constant 0 : index
    %c0_16 = arith.constant 0 : index
    %27 = vector.load %arg8[%c0_15, %c0_16] : memref<16x128xf32, #tpu.memory_space<vmem>>, vector<16x128xf32>
    tpu.vector_store %arg8[%c0_15, %c0_16], %26 {strides = array<i32>} : memref<16x128xf32, #tpu.memory_space<vmem>>, vector<16x128xf32>,
    %c0_i32_17 = arith.constant 0 : i32
    %28 = arith.cmpi eq, %arg1, %c0_i32_17 : i32
    %29 = arith.extui %28 : i1 to i32
    %c0_i32_18 = arith.constant 0 : i32
    %30 = arith.cmpi ne, %29, %c0_i32_18 : i32
    scf.if %30 {
      %c0_19 = arith.constant 0 : index
      %c0_20 = arith.constant 0 : index
      %31 = vector.load %arg8[%c0_19, %c0_20] : memref<16x128xf32, #tpu.memory_space<vmem>>, vector<16x128xf32>
      %c0_21 = arith.constant 0 : index
      %c0_22 = arith.constant 0 : index
      %32 = vector.load %arg6[%c0_21, %c0_22] : memref<1x128xf32, #tpu.memory_space<vmem>>, vector<1x128xf32>
      %33 = vector.broadcast %32 : vector<1x128xf32> to vector<16x128xf32>
      %34 = arith.addf %31, %33 : vector<16x128xf32>
      %c0_23 = arith.constant 0 : index
      %c0_24 = arith.constant 0 : index
      %35 = vector.load %arg7[%c0_23, %c0_24] : memref<16x128xf32, #tpu.memory_space<vmem>>, vector<16x128xf32>
      tpu.vector_store %arg7[%c0_23, %c0_24], %34 {strides = array<i32>} : memref<16x128xf32, #tpu.memory_space<vmem>>, vector<16x128xf32>,
    } else {
    }
    return
  }
  func.func @transform_0(%arg0: i32, %arg1: i32) -> (i32, i32) {
    %c0_i32 = arith.constant 0 : i32
    %c0_i32_0 = arith.constant 0 : i32
    return %arg0, %c0_i32 : i32, i32
  }
  func.func @transform_1(%arg0: i32, %arg1: i32) -> (i32, i32) {
    %c0_i32 = arith.constant 0 : i32
    %c0_i32_0 = arith.constant 0 : i32
    %c0_i32_1 = arith.constant 0 : i32
    return %c0_i32, %c0_i32_0 : i32, i32
  }
  func.func @transform_2(%arg0: i32, %arg1: i32) -> (i32, i32) {
    %c0_i32 = arith.constant 0 : i32
    %c0_i32_0 = arith.constant 0 : i32
    %c0_i32_1 = arith.constant 0 : i32
    return %c0_i32, %c0_i32_0 : i32, i32
  }
  func.func @transform_3(%arg0: i32, %arg1: i32) -> (i32, i32) {
    %c0_i32 = arith.constant 0 : i32
    %c0_i32_0 = arith.constant 0 : i32
    %c0_i32_1 = arith.constant 0 : i32
    return %c0_i32, %c0_i32_0 : i32, i32
  }
  func.func @transform_4(%arg0: i32, %arg1: i32) -> (i32, i32) {
    %c0_i32 = arith.constant 0 : i32
    %c0_i32_0 = arith.constant 0 : i32
    %c0_i32_1 = arith.constant 0 : i32
    return %c0_i32, %c0_i32_0 : i32, i32
  }
  func.func @transform_5(%arg0: i32, %arg1: i32) -> (i32, i32) {
    %c0_i32 = arith.constant 0 : i32
    %c0_i32_0 = arith.constant 0 : i32
    return %arg0, %c0_i32 : i32, i32
  }
}

</mosaic_0001>

<bundles_post_ra>
// kernel: tpu_custom_call.1
= control target key start
LH: loop header
LB: loop body
LE: loop exit
PB: predicated region body
PF: predicated region fallthrough
CT: control target
= control target key end

     0   :  { %10 = vsyncpa [#allocation5], 0  ;;  %s1281_s0 = inlined_call_operand.hbm [shape: f32[16,128], index: 0, kind: input, shape index: {}]   ;;  %s1282_s1 = inlined_call_operand.hbm [shape: bf16[128,512], index: 1, kind: input, shape index: {}]   ;;  %s1283_s2 = inlined_call_operand.vmem [shape: f32[1,512], index: 2, kind: input, shape index: {}]   ;;  %s1284_s3 = inlined_call_operand.hbm [shape: bf16[512,128], index: 3, kind: input, shape index: {}]   ;;  %s1285_s4 = inlined_call_operand.vmem [shape: f32[1,128], index: 4, kind: input, shape index: {}]   ;;  %s1286_s5 = inlined_call_operand.hbm [shape: f32[16,128], index: 5, kind: output, shape index: {}]  }
   0x1   :  { %11 = vsyncpa [#allocation8], 0 }
   0x2   :  { %12 = vsyncpa [#allocation6], 0  ;;  %s1138_s18 = smov [#allocation7]   ;;  %s1044_s22 = scalar_lea.hbm %s1282_s1, 4096 }
   0x3   :  { %s30_s19 = sshll.u32 %s1138_s18, 4  ;;  %p1045_p0 = scmp.ne.s32.totalorder %s1282_s1, %s1044_s22  ;;  %s31_s19 = int_to_ptr.vmem [resolvable:$true] %s30_s19 }
   0x4   :  { %p1048_p1 = scmp.lt.u32.totalorder %s1044_s22, %s1282_s1 }
   0x6   :  { %p1050_p2 = pnand %p1048_p1, %p1045_p0 }
   0x8   :  { %1053 = shalt.err (!%p1050_p2)
}
   0x9   :  { %s1054_s27 = scalar_lea.vmem %s31_s19, 4096  ;;  %p1059_p4 = scmp.lt.s32.totalorder %s31_s19, %s31_s19 }
   0xa   :  { %p1055_p3 = scmp.ne.s32.totalorder %s31_s19, %s1054_s27  ;;  %p1060_p5 = scmp.lt.s32.totalorder %s1054_s27, %s1054_s27 }
   0xc   :  { %p1061_p6 = por %p1060_p5, %p1059_p4 }
   0xe   :  { %p1062_p7 = pnand %p1061_p6, %p1055_p3 }
  0x10   :  { %1065 = shalt.err (!%p1062_p7)
}
  0x11   :  { %s1139_s28 = smov 256   ;;  %s1140_s29 = smov 16  }
  0x12   :  { %36 = dma.hbm_to_vmem [thread:$0]  %s1282_s1, 4096, %s31_s19, [#allocation8], %s1139_s28, %s1139_s28, %s1140_s29  }
  0x13   :  { %s1141_s7 = smov [#allocation4]   ;;  %s1066_s11 = scalar_lea.hbm %s1281_s0, 256 }
  0x14   :  { %s18_s8 = sshll.u32 %s1141_s7, 4  ;;  %p1067_p8 = scmp.ne.s32.totalorder %s1281_s0, %s1066_s11  ;;  %s19_s8 = int_to_ptr.vmem [resolvable:$true] %s18_s8 }
  0x15   :  { %p1070_p9 = scmp.lt.u32.totalorder %s1066_s11, %s1281_s0 }
  0x17   :  { %p1072_p10 = pnand %p1070_p9, %p1067_p8 }
  0x19   :  { %1075 = shalt.err (!%p1072_p10)
}
  0x1a   :  { %s1076_s16 = scalar_lea.vmem %s19_s8, 256  ;;  %p1081_p12 = scmp.lt.s32.totalorder %s19_s8, %s19_s8 }
  0x1b   :  { %p1077_p11 = scmp.ne.s32.totalorder %s19_s8, %s1076_s16  ;;  %p1082_p13 = scmp.lt.s32.totalorder %s1076_s16, %s1076_s16 }
  0x1d   :  { %p1083_p0 = por %p1082_p13, %p1081_p12 }
  0x1f   :  { %p1084_p1 = pnand %p1083_p0, %p1077_p11 }
  0x21   :  { %1087 = shalt.err (!%p1084_p1)
}
  0x22   :  { %s1142_s1 = smov 128   ;;  %s1143_s17 = smov 8  }
  0x23   :  { %24 = dma.hbm_to_vmem [thread:$0]  %s1281_s0, 256, %s19_s8, [#allocation5], %s1142_s1, %s1142_s1, %s1143_s17  }
  0x24   :  { %s1144_s20 = smov [#allocation9]   ;;  %s1088_s24 = scalar_lea.hbm %s1284_s3, 4096 }
  0x25   :  { %s44_s21 = sshll.u32 %s1144_s20, 4  ;;  %p1089_p2 = scmp.ne.s32.totalorder %s1284_s3, %s1088_s24  ;;  %s45_s21 = int_to_ptr.vmem [resolvable:$true] %s44_s21 }
  0x26   :  { %p1092_p3 = scmp.lt.u32.totalorder %s1088_s24, %s1284_s3 }
  0x28   :  { %p1094_p4 = pnand %p1092_p3, %p1089_p2 }
  0x2a   :  { %1097 = shalt.err (!%p1094_p4)
}
  0x2b   :  { %s1098_s29 = scalar_lea.vmem %s45_s21, 4096  ;;  %p1103_p6 = scmp.lt.s32.totalorder %s45_s21, %s45_s21 }
  0x2c   :  { %p1099_p5 = scmp.ne.s32.totalorder %s45_s21, %s1098_s29  ;;  %p1104_p7 = scmp.lt.s32.totalorder %s1098_s29, %s1098_s29 }
  0x2e   :  { %p1105_p8 = por %p1104_p7, %p1103_p6 }
  0x30   :  { %p1106_p9 = pnand %p1105_p8, %p1099_p5 }
  0x32   :  { %1109 = shalt.err (!%p1106_p9)
}
  0x33   :  { %s1145_s0 = smov 64   ;;  %s1146_s30 = smov 4  }
  0x34   :  { %50 = dma.hbm_to_vmem [thread:$0]  %s1284_s3, 4096, %s45_s21, [#allocation8], %s1145_s0, %s1145_s0, %s1146_s30  }
  0x35   :  { %1132 = dma.done.wait [#allocation5], 256  }
  0x36   :  { %1133 = vsyncadd [#allocation5], 4294967040 }
  0x37   :  { %1134 = dma.done.wait [#allocation8], 8192  }
  0x38   :  { %1135 = vsyncadd [#allocation8], 4294959104  ;;  %v1147_v0 = vmov 0   ;;  %v948_v1 = vld [vmem:[#allocation7 + $0x4] ss:$16 sps:$4 sm:$0xff]   ;;  %v70_v34 = vld [vmem:[#allocation4 + $0x8] sm:$0xff] }
  0x39   :  { %320 = vmatprep.mubr.bf16.mxu0 %v1147_v0  ;;  %363 = vmatprep.mubr.bf16.mxu1 %v1147_v0  ;;  %v950_v2 = vld [vmem:[#allocation7 + $0xc] ss:$16 sps:$4 sm:$0xff]   ;;  %v952_v3 = vld [vmem:[#allocation7] ss:$16 sps:$4 sm:$0xff]   ;;  %v953_v4 = vld [vmem:[#allocation7 + $0x8] ss:$16 sps:$4 sm:$0xff]  }
  0x3a   :  { %288 = vmatprep.subr.bf16.mxu0 %v948_v1  ;;  %331 = vmatprep.subr.bf16.mxu1 %v950_v2  ;;  %v954_v5 = vld [vmem:[#allocation7 + $0x24] ss:$16 sps:$4 sm:$0xff]   ;;  %v956_v6 = vld [vmem:[#allocation7 + $0x2c] ss:$16 sps:$4 sm:$0xff]   ;;  %v958_v7 = vld [vmem:[#allocation7 + $0x20] ss:$16 sps:$4 sm:$0xff]  }
  0x3b   :  { %289 = vmatpush1.bf16.msra.mxu0 %v952_v3  ;;  %332 = vmatpush1.bf16.msra.mxu1 %v953_v4  ;;  %v959_v8 = vld [vmem:[#allocation7 + $0x28] ss:$16 sps:$4 sm:$0xff]   ;;  %v960_v9 = vld [vmem:[#allocation7 + $0x44] ss:$16 sps:$4 sm:$0xff]   ;;  %v962_v10 = vld [vmem:[#allocation7 + $0x4c] ss:$16 sps:$4 sm:$0xff]   ;;  %v108_v4 = vlaneseq }
  0x3c   :  { %290 = vmatprep.subr.bf16.mxu0 %v954_v5  ;;  %333 = vmatprep.subr.bf16.mxu1 %v956_v6  ;;  %v964_v11 = vld [vmem:[#allocation7 + $0x40] ss:$16 sps:$4 sm:$0xff]   ;;  %v965_v12 = vld [vmem:[#allocation7 + $0x48] ss:$16 sps:$4 sm:$0xff]   ;;  %v966_v13 = vld [vmem:[#allocation7 + $0x64] ss:$16 sps:$4 sm:$0xff]  }
  0x3d   :  { %v968_v14 = vld [vmem:[#allocation7 + $0x6c] ss:$16 sps:$4 sm:$0xff]   ;;  %v970_v15 = vld [vmem:[#allocation7 + $0x60] ss:$16 sps:$4 sm:$0xff]   ;;  %v971_v16 = vld [vmem:[#allocation7 + $0x68] ss:$16 sps:$4 sm:$0xff]  }
  0x3e   :  { %v972_v17 = vld [vmem:[#allocation7 + $0x84] ss:$16 sps:$4 sm:$0xff]   ;;  %v974_v18 = vld [vmem:[#allocation7 + $0x8c] ss:$16 sps:$4 sm:$0xff]   ;;  %v976_v19 = vld [vmem:[#allocation7 + $0x80] ss:$16 sps:$4 sm:$0xff]  }
  0x3f   :  { %291 = vmatpush1.bf16.msra.mxu0 %v958_v7  ;;  %334 = vmatpush1.bf16.msra.mxu1 %v959_v8  ;;  %v977_v20 = vld [vmem:[#allocation7 + $0x88] ss:$16 sps:$4 sm:$0xff]   ;;  %v978_v21 = vld [vmem:[#allocation7 + $0xa4] ss:$16 sps:$4 sm:$0xff]   ;;  %v980_v22 = vld [vmem:[#allocation7 + $0xac] ss:$16 sps:$4 sm:$0xff]  }
  0x40   :  { %292 = vmatprep.subr.bf16.mxu0 %v960_v9  ;;  %335 = vmatprep.subr.bf16.mxu1 %v962_v10  ;;  %v982_v23 = vld [vmem:[#allocation7 + $0xa0] ss:$16 sps:$4 sm:$0xff]   ;;  %v983_v24 = vld [vmem:[#allocation7 + $0xa8] ss:$16 sps:$4 sm:$0xff]   ;;  %v984_v25 = vld [vmem:[#allocation7 + $0xc4] ss:$16 sps:$4 sm:$0xff]  }
  0x41   :  { %v986_v26 = vld [vmem:[#allocation7 + $0xcc] ss:$16 sps:$4 sm:$0xff]   ;;  %v988_v27 = vld [vmem:[#allocation7 + $0xc0] ss:$16 sps:$4 sm:$0xff]   ;;  %v989_v28 = vld [vmem:[#allocation7 + $0xc8] ss:$16 sps:$4 sm:$0xff]  }
  0x42   :  { %v990_v29 = vld [vmem:[#allocation7 + $0xe4] ss:$16 sps:$4 sm:$0xff]   ;;  %v992_v30 = vld [vmem:[#allocation7 + $0xec] ss:$16 sps:$4 sm:$0xff]   ;;  %v994_v31 = vld [vmem:[#allocation7 + $0xe0] ss:$16 sps:$4 sm:$0xff]  }
  0x43   :  { %293 = vmatpush1.bf16.msra.mxu0 %v964_v11  ;;  %336 = vmatpush1.bf16.msra.mxu1 %v965_v12  ;;  %v995_v32 = vld [vmem:[#allocation7 + $0xe8] ss:$16 sps:$4 sm:$0xff]   ;;  %v69_v33 = vld [vmem:[#allocation4] sm:$0xff]  ;;  %v996_v36 = vld [vmem:[#allocation9 + $0x40] sm:$0xff]   ;;  %v109_v5 = vshrl.u32 %v108_v4, 7  ;;  %s1148_s10 = smov [#allocation10]  }
  0x44   :  { %294 = vmatprep.subr.bf16.mxu0 %v966_v13  ;;  %337 = vmatprep.subr.bf16.mxu1 %v968_v14  ;;  %v71_v35 = vpack.c.bf16 %v70_v34, %v69_v33  ;;  %v997_v37 = vld [vmem:[#allocation9 + $0xc0] sm:$0xff]   ;;  %v1000_v40 = vld [vmem:[#allocation9 + $0x48] sm:$0xff]   ;;  %v1004_v44 = vld [vmem:[#allocation9 + $0x50] sm:$0xff]   ;;  %s815_s11 = sshll.u32 %s1148_s10, 4  ;;  %s816_s11 = int_to_ptr.vmem [resolvable:$true] %s815_s11 }
  0x45   :  { %v998_v38 = vld [vmem:[#allocation9] sm:$0xff]   ;;  %v1001_v41 = vld [vmem:[#allocation9 + $0xc8] sm:$0xff]   ;;  %v1005_v45 = vld [vmem:[#allocation9 + $0xd0] sm:$0xff]   ;;  %v110_v6 = vsub.s32 0, %v109_v5  ;;  %v118_v7 = vsub.s32 2, %v109_v5  ;;  %v114_v9 = vsub.s32 1, %v109_v5  ;;  %p1115_p11 = scmp.lt.s32.totalorder %s816_s11, %s816_s11 }
  0x46   :  { %v999_v39 = vld [vmem:[#allocation9 + $0x80] sm:$0xff]   ;;  %v1002_v42 = vld [vmem:[#allocation9 + $0x8] sm:$0xff]   ;;  %v1006_v46 = vld [vmem:[#allocation9 + $0x10] sm:$0xff]   ;;  %v122_v10 = vsub.s32 3, %v109_v5  ;;  %s1110_s12 = scalar_lea.vmem %s816_s11, 256 }
  0x47   :  { %295 = vmatpush1.bf16.msra.mxu0 %v970_v15  ;;  %338 = vmatpush1.bf16.msra.mxu1 %v971_v16  ;;  %v1003_v43 = vld [vmem:[#allocation9 + $0x88] sm:$0xff]   ;;  %v1007_v47 = vld [vmem:[#allocation9 + $0x90] sm:$0xff]   ;;  %v1008_v48 = vld [vmem:[#allocation9 + $0x58] sm:$0xff]   ;;  %p1111_p10 = scmp.ne.s32.totalorder %s816_s11, %s1110_s12  ;;  %p1116_p12 = scmp.lt.s32.totalorder %s1110_s12, %s1110_s12 }
  0x48   :  { %296 = vmatprep.subr.bf16.mxu0 %v972_v17  ;;  %339 = vmatprep.subr.bf16.mxu1 %v974_v18  ;;  %v1009_v49 = vld [vmem:[#allocation9 + $0xd8] sm:$0xff]   ;;  %v1012_v52 = vld [vmem:[#allocation9 + $0x60] sm:$0xff]   ;;  %v1016_v56 = vld [vmem:[#allocation9 + $0x68] sm:$0xff]  }
  0x49   :  { %v1010_v50 = vld [vmem:[#allocation9 + $0x18] sm:$0xff]   ;;  %v1013_v53 = vld [vmem:[#allocation9 + $0xe0] sm:$0xff]   ;;  %v1017_v57 = vld [vmem:[#allocation9 + $0xe8] sm:$0xff]   ;;  %p1117_p13 = por %p1116_p12, %p1115_p11 }
  0x4a   :  { %v1011_v51 = vld [vmem:[#allocation9 + $0x98] sm:$0xff]   ;;  %v1014_v54 = vld [vmem:[#allocation9 + $0x20] sm:$0xff]   ;;  %v1018_v58 = vld [vmem:[#allocation9 + $0x28] sm:$0xff]  }
  0x4b   :  { %297 = vmatpush1.bf16.msra.mxu0 %v976_v19  ;;  %340 = vmatpush1.bf16.msra.mxu1 %v977_v20  ;;  %v1015_v55 = vld [vmem:[#allocation9 + $0xa0] sm:$0xff]   ;;  %v1019_v59 = vld [vmem:[#allocation9 + $0xa8] sm:$0xff]   ;;  %v1020_v60 = vld [vmem:[#allocation9 + $0x70] sm:$0xff]   ;;  %p1118_p0 = pnand %p1117_p13, %p1111_p10 }
  0x4c   :  { %298 = vmatprep.subr.bf16.mxu0 %v978_v21  ;;  %341 = vmatprep.subr.bf16.mxu1 %v980_v22  ;;  %v1021_v61 = vld [vmem:[#allocation9 + $0xf0] sm:$0xff]   ;;  %v1024_v0 = vld [vmem:[#allocation9 + $0x78] sm:$0xff]  }
  0x4d   :  { %v1022_v62 = vld [vmem:[#allocation9 + $0x30] sm:$0xff]   ;;  %v1025_v1 = vld [vmem:[#allocation9 + $0xf8] sm:$0xff]  }
  0x4e   :  { %v1023_v63 = vld [vmem:[#allocation9 + $0xb0] sm:$0xff]   ;;  %v1026_v2 = vld [vmem:[#allocation9 + $0x38] sm:$0xff]  }
  0x4f   :  { %299 = vmatpush1.bf16.msra.mxu0 %v982_v23  ;;  %342 = vmatpush1.bf16.msra.mxu1 %v983_v24  ;;  %v1027_v3 = vld [vmem:[#allocation9 + $0xb8] sm:$0xff]   ;;  %v106_v8 = vld [vmem:[%s1283_s2] sm:$0xf] }
  0x50   :  { %300 = vmatprep.subr.bf16.mxu0 %v984_v25  ;;  %343 = vmatprep.subr.bf16.mxu1 %v986_v26  ;;  %v111_v11 = vrot.slane %v106_v8, %v110_v6  ;;  %v119_v12 = vrot.slane %v106_v8, %v118_v7  ;;  %v115_v13 = vrot.slane %v106_v8, %v114_v9 }
  0x51   :  { %v123_v14 = vrot.slane %v106_v8, %v122_v10 }
  0x53   :  { %301 = vmatpush1.bf16.msra.mxu0 %v988_v27  ;;  %344 = vmatpush1.bf16.msra.mxu1 %v989_v28 }
  0x54   :  { %302 = vmatprep.subr.bf16.mxu0 %v990_v29  ;;  %345 = vmatprep.subr.bf16.mxu1 %v992_v30 }
  0x57   :  { %303 = vmatpush1.bf16.msra.mxu0 %v994_v31  ;;  %346 = vmatpush1.bf16.msra.mxu1 %v995_v32 }
  0x58   :  { %893 = vmatprep.subr.bf16.mxu0 %v996_v36  ;;  %915 = vmatprep.subr.bf16.mxu1 %v997_v37 }
  0x5a   :  { %321 = vmatmul.mubr.bf16.vlgmr.msra.gmra.mrb[0].mxu0 %v71_v35  ;;  %364 = vmatmul.mubr.bf16.vlgmr.msra.gmra.mrb[0].mxu1 %v71_v35 }
  0x5b   :  { %894 = vmatpush3.bf16.msra.mxu0 %v998_v38  ;;  %916 = vmatpush3.bf16.msra.mxu1 %v999_v39 }
  0x5c   :  { %895 = vmatprep.subr.bf16.mxu0 %v1000_v40  ;;  %917 = vmatprep.subr.bf16.mxu1 %v1001_v41 }
  0x5f   :  { %896 = vmatpush3.bf16.msra.mxu0 %v1002_v42  ;;  %918 = vmatpush3.bf16.msra.mxu1 %v1003_v43 }
  0x60   :  { %897 = vmatprep.subr.bf16.mxu0 %v1004_v44  ;;  %919 = vmatprep.subr.bf16.mxu1 %v1005_v45 }
  0x63   :  { %898 = vmatpush3.bf16.msra.mxu0 %v1006_v46  ;;  %920 = vmatpush3.bf16.msra.mxu1 %v1007_v47 }
  0x64   :  { %899 = vmatprep.subr.bf16.mxu0 %v1008_v48  ;;  %921 = vmatprep.subr.bf16.mxu1 %v1009_v49 }
  0x67   :  { %900 = vmatpush3.bf16.msra.mxu0 %v1010_v50  ;;  %922 = vmatpush3.bf16.msra.mxu1 %v1011_v51 }
  0x68   :  { %901 = vmatprep.subr.bf16.mxu0 %v1012_v52  ;;  %923 = vmatprep.subr.bf16.mxu1 %v1013_v53 }
  0x6b   :  { %902 = vmatpush3.bf16.msra.mxu0 %v1014_v54  ;;  %924 = vmatpush3.bf16.msra.mxu1 %v1015_v55 }
  0x6c   :  { %903 = vmatprep.subr.bf16.mxu0 %v1016_v56  ;;  %925 = vmatprep.subr.bf16.mxu1 %v1017_v57 }
  0x6f   :  { %904 = vmatpush3.bf16.msra.mxu0 %v1018_v58  ;;  %926 = vmatpush3.bf16.msra.mxu1 %v1019_v59 }
  0x70   :  { %905 = vmatprep.subr.bf16.mxu0 %v1020_v60  ;;  %927 = vmatprep.subr.bf16.mxu1 %v1021_v61 }
  0x73   :  { %906 = vmatpush3.bf16.msra.mxu0 %v1022_v62  ;;  %928 = vmatpush3.bf16.msra.mxu1 %v1023_v63 }
  0x74   :  { %907 = vmatprep.subr.bf16.mxu0 %v1024_v0  ;;  %929 = vmatprep.subr.bf16.mxu1 %v1025_v1 }
  0x77   :  { %908 = vmatpush3.bf16.msra.mxu0 %v1026_v2  ;;  %930 = vmatpush3.bf16.msra.mxu1 %v1027_v3 }
 0x12d   :  { %v322_v15 = vpop.f32.mrb[0].mxu0  ;;  %v365_v16 = vpop.f32.mrb[0].mxu1 }
 0x12e   :  { %v1221_v17 = vadd.f32 %v322_v15, %v111_v11  ;;  %v1223_v18 = vadd.f32 %v365_v16, %v119_v12  ;;  %v324_v19 = vpop.f32.mrb[1].mxu0  ;;  %v367_v20 = vpop.f32.mrb[1].mxu1 }
 0x12f   :  { %v1225_v21 = vadd.f32 %v324_v19, %v115_v13  ;;  %v1227_v22 = vadd.f32 %v367_v20, %v123_v14  ;;  %v326_v23 = vpop.f32.mrb[2].mxu0  ;;  %v369_v24 = vpop.f32.mrb[2].mxu1 }
 0x130   :  { %v382_v25 = vmul.f32 0.044715, %v1221_v17  ;;  %v384_v26 = vmul.f32 0.044715, %v1223_v18  ;;  %v327_v27 = vadd.f32 %v326_v23, %v111_v11  ;;  %v370_v28 = vadd.f32 %v369_v24, %v119_v12  ;;  %v328_v29 = vpop.f32.mrb[3].mxu0  ;;  %v371_v30 = vpop.f32.mrb[3].mxu1 }
 0x131   :  { %v383_v31 = vmul.f32 0.044715, %v1225_v21  ;;  %v385_v32 = vmul.f32 0.044715, %v1227_v22  ;;  %v1233_v33 = vadd.f32 %v328_v29, %v115_v13  ;;  %v1235_v34 = vadd.f32 %v371_v30, %v123_v14 }
 0x132   :  { %v390_v35 = vmul.f32 %v382_v25, %v1221_v17  ;;  %v392_v36 = vmul.f32 %v384_v26, %v1223_v18  ;;  %v386_v37 = vmul.f32 0.044715, %v327_v27  ;;  %v388_v38 = vmul.f32 0.044715, %v370_v28 }
 0x133   :  { %v391_v39 = vmul.f32 %v383_v31, %v1225_v21  ;;  %v393_v40 = vmul.f32 %v385_v32, %v1227_v22  ;;  %v387_v41 = vmul.f32 0.044715, %v1233_v33  ;;  %v389_v42 = vmul.f32 0.044715, %v1235_v34 }
 0x134   :  { %v398_v43 = vmul.f32 %v390_v35, %v1221_v17  ;;  %v400_v44 = vmul.f32 %v392_v36, %v1223_v18  ;;  %v394_v45 = vmul.f32 %v386_v37, %v327_v27  ;;  %v396_v46 = vmul.f32 %v388_v38, %v370_v28 }
 0x135   :  { %v399_v47 = vmul.f32 %v391_v39, %v1225_v21  ;;  %v401_v48 = vmul.f32 %v393_v40, %v1227_v22  ;;  %v395_v49 = vmul.f32 %v387_v41, %v1233_v33  ;;  %v397_v50 = vmul.f32 %v389_v42, %v1235_v34 }
 0x136   :  { %v406_v51 = vadd.f32 %v398_v43, %v1221_v17  ;;  %v408_v52 = vadd.f32 %v400_v44, %v1223_v18  ;;  %v402_v53 = vmul.f32 %v394_v45, %v327_v27  ;;  %v404_v54 = vmul.f32 %v396_v46, %v370_v28 }
 0x137   :  { %v403_v55 = vmul.f32 %v395_v49, %v1233_v33  ;;  %v405_v56 = vmul.f32 %v397_v50, %v1235_v34  ;;  %v407_v61 = vadd.f32 %v399_v47, %v1225_v21  ;;  %v409_v1 = vadd.f32 %v401_v48, %v1227_v22 }
 0x138   :  { %v414_v57 = vmul.f32 0.7978846, %v406_v51  ;;  %v416_v58 = vmul.f32 0.7978846, %v408_v52  ;;  %v410_v59 = vadd.f32 %v402_v53, %v327_v27  ;;  %v412_v60 = vadd.f32 %v404_v54, %v370_v28  ;;  %v892_v53 = vld [vmem:[%s1285_s4] ss:$0 sm:$0xff] }
 0x139   :  { %v411_v62 = vadd.f32 %v403_v55, %v1233_v33  ;;  %v415_v2 = vmul.f32 0.7978846, %v407_v61  ;;  %v413_v4 = vadd.f32 %v405_v56, %v1235_v34  ;;  %v417_v5 = vmul.f32 0.7978846, %v409_v1 }
 0x13a   :  { %1028 = vtanh.f32 %v414_v57  ;;  %v418_v63 = vmul.f32 0.7978846, %v410_v59  ;;  %v420_v0 = vmul.f32 0.7978846, %v412_v60  ;;  %v374_v13 = vmul.f32 0.5, %v1221_v17 }
 0x13b   :  { %1030 = vtanh.f32 %v416_v58  ;;  %v419_v3 = vmul.f32 0.7978846, %v411_v62  ;;  %v421_v6 = vmul.f32 0.7978846, %v413_v4  ;;  %v378_v14 = vmul.f32 0.5, %v327_v27 }
 0x13c   :  { %1032 = vtanh.f32 %v418_v63  ;;  %v376_v19 = vmul.f32 0.5, %v1223_v18  ;;  %v380_v20 = vmul.f32 0.5, %v370_v28  ;;  %v375_v25 = vmul.f32 0.5, %v1225_v21 }
 0x13d   :  { %1034 = vtanh.f32 %v420_v0  ;;  %v379_v32 = vmul.f32 0.5, %v1233_v33  ;;  %v377_v27 = vmul.f32 0.5, %v1227_v22  ;;  %v381_v38 = vmul.f32 0.5, %v1235_v34 }
 0x13e   :  { %1036 = vtanh.f32 %v415_v2 }
 0x13f   :  { %1038 = vtanh.f32 %v419_v3 }
 0x140   :  { %1040 = vtanh.f32 %v417_v5 }
 0x141   :  { %1042 = vtanh.f32 %v421_v6 }
 0x144   :  { %v1029_v7 = vpop.eup %1028 }
 0x145   :  { %v1031_v8 = vpop.eup %1030  ;;  %v430_v9 = vadd.f32 1.0, %v1029_v7 }
 0x146   :  { %v1033_v10 = vpop.eup %1032  ;;  %v432_v11 = vadd.f32 1.0, %v1031_v8 }
 0x147   :  { %v1035_v12 = vpop.eup %1034  ;;  %v434_v15 = vadd.f32 1.0, %v1033_v10  ;;  %v438_v29 = vmul.f32 %v430_v9, %v374_v13 }
 0x148   :  { %v1037_v16 = vpop.eup %1036  ;;  %v436_v23 = vadd.f32 1.0, %v1035_v12  ;;  %v440_v36 = vmul.f32 %v432_v11, %v376_v19 }
 0x149   :  { %v1039_v24 = vpop.eup %1038  ;;  %v431_v26 = vadd.f32 1.0, %v1037_v16  ;;  %v442_v30 = vmul.f32 %v434_v15, %v378_v14 }
 0x14a   :  { %v1041_v31 = vpop.eup %1040  ;;  %v435_v35 = vadd.f32 1.0, %v1039_v24  ;;  %v444_v37 = vmul.f32 %v436_v23, %v380_v20 }
 0x14b   :  { %v1043_v17 = vpop.eup %1042  ;;  %v433_v18 = vadd.f32 1.0, %v1041_v31  ;;  %v448_v28 = vpack.c.bf16 %v442_v30, %v438_v29  ;;  %v439_v39 = vmul.f32 %v431_v26, %v375_v25 }
 0x14c   :  { %v443_v40 = vmul.f32 %v435_v35, %v379_v32  ;;  %v437_v41 = vadd.f32 1.0, %v1043_v17  ;;  %v450_v21 = vpack.c.bf16 %v444_v37, %v440_v36 }
 0x14d   :  { %v441_v43 = vmul.f32 %v433_v18, %v377_v27 }
 0x14e   :  { %v449_v42 = vpack.c.bf16 %v443_v40, %v439_v39  ;;  %v445_v44 = vmul.f32 %v437_v41, %v381_v38 }
 0x150   :  { %740 = vmatprep.mubr.bf16.mxu0 %v449_v42  ;;  %v451_v45 = vpack.c.bf16 %v445_v44, %v441_v43 }
 0x151   :  { %741 = vmatmul.mubr.bf16.vlgmr.msra.gmra.mrb[4].mxu0 %v448_v28 }
 0x152   :  { %781 = vmatprep.mubr.bf16.mxu1 %v451_v45 }
 0x153   :  { %782 = vmatmul.mubr.bf16.vlgmr.msra.gmra.mrb[4].mxu1 %v450_v21 }
 0x224   :  { %v909_v33 = vpop.f32.mrb[4].mxu0 }
 0x225   :  { %v910_v46 = vpop.f32.mrb[5].mxu0 }
 0x226   :  { %v931_v47 = vpop.f32.mrb[4].mxu1  ;;  %v911_v22 = vadd.f32 %v910_v46, %v909_v33  ;;  %v912_v48 = vpop.f32.mrb[6].mxu0 }
 0x227   :  { %v932_v34 = vpop.f32.mrb[5].mxu1  ;;  %v913_v49 = vpop.f32.mrb[7].mxu0 }
 0x228   :  { %v933_v50 = vadd.f32 %v932_v34, %v931_v47  ;;  %v934_v51 = vpop.f32.mrb[6].mxu1  ;;  %v914_v52 = vadd.f32 %v913_v49, %v912_v48 }
 0x229   :  { %v935_v54 = vpop.f32.mrb[7].mxu1 }
 0x22a   :  { %v784_v55 = vadd.f32 %v933_v50, %v911_v22  ;;  %v936_v56 = vadd.f32 %v935_v54, %v934_v51 }
 0x22c   :  { %v806_v57 = vadd.f32 %v892_v53, %v784_v55  ;;  %v787_v58 = vadd.f32 %v936_v56, %v914_v52 }
 0x22e   :  { %808 = vst [vmem:[#allocation10] sm:$0xff] %v806_v57  ;;  %v807_v59 = vadd.f32 %v892_v53, %v787_v58 }
 0x230   :  { %809 = vst [vmem:[#allocation10 + $0x8] sm:$0xff] %v807_v59 }
 0x231   :  { %1121 = shalt.err (!%p1118_p0)
}
 0x232   :  { %s1122_s14 = scalar_lea.hbm %s1286_s5, 256 }
 0x233   :  { %p1123_p1 = scmp.ne.s32.totalorder %s1286_s5, %s1122_s14  ;;  %p1126_p2 = scmp.lt.u32.totalorder %s1122_s14, %s1286_s5 }
 0x235   :  { %p1128_p3 = pnand %p1126_p2, %p1123_p1 }
 0x237   :  { %1131 = shalt.err (!%p1128_p3)
}
 0x238   :  { %821 = dma.vmem_to_hbm [thread:$0]  %s816_s11, 256, %s1286_s5, [#allocation6], %s1142_s1, %s1142_s1, %s1143_s17  }
 0x239   :  { %1136 = dma.done.wait [#allocation6], 256  }
 0x23a   :  { %1137 = vsyncadd [#allocation6], 4294967040 }
 0x23b   :  { %825 = vsyncpa [#allocation5], 1 }
 0x23c   :  { %826 = vsyncpa [#allocation8], 1 }
 0x23d   :  { %827 = vsyncpa [#allocation6], 1 }

</bundles_post_ra>
